<compile_context>
chip_gen: v6e
topology: v6e:2x2x1
jax: 0.10.0
libtpu: 0.0.40
codegen_flags: <defaults>
</compile_context>

<pallas_src>
import jax
import jax.numpy as jnp
from jax.experimental import pallas as pl
from jax.experimental.pallas import tpu as pltpu


# Per-output-tile VMEM budget. Double-buffered this is ~24 MiB, which is safe on
# v7x (64 MiB VMEM / TC) and still large enough on v5e/v6e to sit near the HBM
# write roofline.
_PER_TILE_BUDGET_BYTES = 12 * 1024 * 1024


def _pick_batch_tile(batch: int, layers: int, embed: int, itemsize: int) -> int:
    """Largest batch tile that (a) fits the VMEM budget double-buffered and
    (b) satisfies the (8,128) block constraint (tb == batch, or tb % 8 == 0
    and tb divides batch)."""
    row_bytes = layers * embed * itemsize
    max_tb = max(1, _PER_TILE_BUDGET_BYTES // row_bytes)
    if batch <= max_tb:
        return batch
    tb = (min(max_tb, batch) // 8) * 8
    while tb >= 8 and batch % tb != 0:
        tb -= 8
    if tb >= 8:
        return tb
    # TODO(synk): batch not divisible by any multiple of 8 that fits VMEM; fall back
    # to a single (possibly oversized) tile rather than masked tail handling.
    return batch


def _state_gen_kernel(state_ref, out_ref):
    # state_ref: (1, layers, 1, embed)  -- h or c slot of the parameter (VMEM).
    #            Its block index only depends on the h/c grid axis, so it is
    #            DMA'd once per slot, not once per batch tile.
    # out_ref:   (1, layers, tb, embed) -- current output batch tile.
    out_ref[...] = jnp.broadcast_to(state_ref[...], out_ref.shape)


def lstm_state_gen(state: jax.Array, batch: int, *, force_pallas: bool = False):
    """Pallas implementation of LSTMStateGen.forward(batch).

    state: (2, layers, 1, embed)
    returns: ((h, c),) with h, c of shape (layers, batch, embed)
    """
    two, layers, one, embed = state.shape
    assert two == 2 and one == 1

    itemsize = jnp.dtype(state.dtype).itemsize
    out_bytes = 2 * layers * batch * embed * itemsize
    state_bytes = 2 * layers * embed * itemsize
    lane_dense = (embed % 128) == 0

    # Size / layout gate: for tiny outputs the pallas_call launch overhead dominates,
    # and for embed not a multiple of 128 every store would be a masked vst.msk.
    # In both cases a plain broadcast (which XLA can also fuse into the consumer,
    # avoiding materialization entirely) is strictly better.
    if not force_pallas and (out_bytes < (1 << 20) or not lane_dense):
        out = jnp.broadcast_to(state, (2, layers, batch, embed))
        return ((out[0], out[1]),)

    tb = _pick_batch_tile(batch, layers, embed, itemsize)
    nb = batch // tb
    tile_bytes = layers * tb * embed * itemsize

    # Explicit VMEM budget: 2x output tile (double buffer) + 2x the (tiny) state
    # input + slack. Stays well under the 64 MiB physical VMEM on v7x.
    vmem_limit = int(2 * tile_bytes + 2 * state_bytes + (4 << 20))

    cost = pl.CostEstimate(
        flops=0,
        transcendentals=0,
        bytes_accessed=out_bytes + state_bytes,
    )

    out = pl.pallas_call(
        _state_gen_kernel,
        out_shape=jax.ShapeDtypeStruct((2, layers, batch, embed), state.dtype),
        grid_spec=pltpu.PrefetchScalarGridSpec(
            num_scalar_prefetch=0,
            # (h/c slot, batch tile); batch is the fast axis so the input block
            # index stays constant across it (input fetched only twice total).
            grid=(2, nb),
            in_specs=[
                pl.BlockSpec((1, layers, 1, embed), lambda i, b: (i, 0, 0, 0)),
            ],
            out_specs=pl.BlockSpec(
                (1, layers, tb, embed), lambda i, b: (i, 0, b, 0)
            ),
        ),
        compiler_params=pltpu.CompilerParams(
            # Both axes are independent writes; on v7x the many-step batch axis
            # lets the two TensorCores split the streaming stores.
            dimension_semantics=("parallel", "parallel"),
            vmem_limit_bytes=vmem_limit,
        ),
        cost_estimate=cost,
    )(state)

    # PyTorch: tuple(state.repeat(1, 1, batch, 1)) iterates dim 0 -> (h, c)
    return ((out[0], out[1]),)


if __name__ == "__main__":
    # Small but lane-dense configuration so the Pallas path is exercised.
    layers = 2
    embed = 128
    batch = 8

    key = jax.random.PRNGKey(0)
    state = jax.random.uniform(key, (2, layers, 1, embed), dtype=jnp.float32)

    ((h, c),) = lstm_state_gen(state, batch, force_pallas=True)
    jax.block_until_ready(h)
    jax.block_until_ready(c)

    ref = jnp.broadcast_to(state, (2, layers, batch, embed))
    assert h.shape == (layers, batch, embed)
    assert c.shape == (layers, batch, embed)
    assert jnp.allclose(h, ref[0])
    assert jnp.allclose(c, ref[1])

    # Also exercise the size-gated XLA fallback (tiny, non-lane-dense embed).
    small_state = jax.random.uniform(
        jax.random.PRNGKey(0), (2, 1, 1, 32), dtype=jnp.float32
    )
    ((hs, cs),) = lstm_state_gen(small_state, 2)
    jax.block_until_ready(hs)
    ref_s = jnp.broadcast_to(small_state, (2, 1, 2, 32))
    assert jnp.allclose(hs, ref_s[0]) and jnp.allclose(cs, ref_s[1])

    print("KERNEL_OK")
</pallas_src>

<mosaic_0001>
module attributes {stable_mosaic.version = 11 : i64} {
  func.func @_state_gen_kernel(%arg0: i32, %arg1: i32, %arg2: memref<1x2x1x128xf32, #tpu.memory_space<vmem>>, %arg3: memref<1x2x8x128xf32, #tpu.memory_space<vmem>>) attributes {dimension_semantics = [#tpu.dimension_semantics<parallel>, #tpu.dimension_semantics<parallel>], iteration_bounds = array<i64: 2, 1>, scalar_prefetch = 0 : i64, scratch_operands = 0 : i64, tpu.core_type = #tpu.core_type<tc>, window_params = [{transform_indices = @transform_0, window_bounds = array<i64: 1, 2, 1, 128>}, {transform_indices = @transform_1, window_bounds = array<i64: 1, 2, 8, 128>}]} {
    %c0 = arith.constant 0 : index
    %c0_0 = arith.constant 0 : index
    %c0_1 = arith.constant 0 : index
    %c0_2 = arith.constant 0 : index
    %0 = vector.load %arg2[%c0, %c0_0, %c0_1, %c0_2] : memref<1x2x1x128xf32, #tpu.memory_space<vmem>>, vector<1x2x1x128xf32>
    %1 = vector.shape_cast %0 : vector<1x2x1x128xf32> to vector<1x2x1x128xf32>
    %2 = vector.broadcast %1 : vector<1x2x1x128xf32> to vector<1x2x8x128xf32>
    %c0_3 = arith.constant 0 : index
    %c0_4 = arith.constant 0 : index
    %c0_5 = arith.constant 0 : index
    %c0_6 = arith.constant 0 : index
    %3 = vector.load %arg3[%c0_3, %c0_4, %c0_5, %c0_6] : memref<1x2x8x128xf32, #tpu.memory_space<vmem>>, vector<1x2x8x128xf32>
    tpu.vector_store %arg3[%c0_3, %c0_4, %c0_5, %c0_6], %2 {strides = array<i32>} : memref<1x2x8x128xf32, #tpu.memory_space<vmem>>, vector<1x2x8x128xf32>,
    return
  }
  func.func @transform_0(%arg0: i32, %arg1: i32) -> (i32, i32, i32, i32) {
    %c0_i32 = arith.constant 0 : i32
    %c0_i32_0 = arith.constant 0 : i32
    %c0_i32_1 = arith.constant 0 : i32
    %c0_i32_2 = arith.constant 0 : i32
    return %arg0, %c0_i32, %c0_i32_0, %c0_i32_1 : i32, i32, i32, i32
  }
  func.func @transform_1(%arg0: i32, %arg1: i32) -> (i32, i32, i32, i32) {
    %c0_i32 = arith.constant 0 : i32
    %c0_i32_0 = arith.constant 0 : i32
    %c0_i32_1 = arith.constant 0 : i32
    return %arg0, %c0_i32, %arg1, %c0_i32_0 : i32, i32, i32, i32
  }
}

</mosaic_0001>

<bundles_post_ra>
// kernel: tpu_custom_call.1
= control target key start
LH: loop header
LB: loop body
LE: loop exit
PB: predicated region body
PF: predicated region fallthrough
CT: control target
= control target key end

     0   :  { %6 = vsyncpa [#allocation3], 0  ;;  %s621_s0 = inlined_call_operand.hbm [shape: f32[2,2,1,128], index: 0, kind: input, shape index: {}]   ;;  %s622_s1 = inlined_call_operand.hbm [shape: f32[2,2,8,128], index: 1, kind: output, shape index: {}]  }
   0x1   :  { %8 = vsyncpa [#allocation3 + $0x1], 0 }
   0x2   :  { %9 = vsyncpa [#allocation4], 0 }
   0x3   :  { %11 = vsyncpa [#allocation4 + $0x1], 0  ;;  %s474_s6 = smov 0   ;;  %s476_s7 = smov 0  }
   0x4   :  { %s478_s8 = smov 0   ;;  %s480_s9 = smov 0  }
   0x5   :  { %s482_s10 = smov 0   ;;  %s484_s11 = smov 0  }
   0x6 LB: > { %s263_s12 = sadd.s32 4294967295, %s456_s11   ;;  %s264_s13 = sadd.s32 4294967294, %s456_s11   ;;  %s456_s11 = sphi %s484_s11, %s17_s11   ;;  %s452_s10 = sphi %s482_s10, %s633_s10   ;;  %s448_s9 = sphi %s480_s9, %s632_s9   ;;  %s444_s8 = sphi %s478_s8, %s631_s8   ;;  %s440_s7 = sphi %s476_s7, %s630_s7   ;;  %s436_s6 = sphi %s474_s6, %s629_s6  }
   0x7   : > { %s29_s14 = sadd.s32 1, %s452_s10  ;;  %s36_s15 = sadd.s32 1, %s444_s8 }
   0x8   : > { %p31_p0 = scmp.ge.s32.totalorder %s29_s14, 2  ;;  %p43_p1 = scmp.ne.s32.totalorder %s444_s8, %s440_s7 }
   0x9   : > { %p44_p2 = scmp.eq.s32.totalorder %s456_s11, 0  ;;  %p49_p3 = scmp.ne.s32.totalorder %s440_s7, %s436_s6 }
   0xa   : > { %s635_s14 = smov (%p31_p0, %s29_s14), 0  ;;  %p50_p5 = scmp.eq.s32.totalorder %s263_s12, 0 }
   0xb   : > { %p515_p4 = por %p44_p2, %p43_p1  ;;  %s33_s17 = ssub.s32 %s452_s10, %s635_s14 }
   0xc   : > { %p75_p6 = scmp.eq.s32.totalorder %s263_s12, 1  ;;  %p34_p7 = scmp.eq.s32.totalorder %s33_s17, 0 }
   0xd   : > { %p521_p8 = por %p50_p5, %p49_p3  ;;  %p81_p10 = scmp.eq.s32.totalorder %s264_s13, 1 }
   0xe   : > { %p525_p9 = por %p75_p6, %p43_p1  ;;  %p294_p13 = scmp.lt.s32.totalorder %s456_s11, 2 }
   0xf   : > { %s530_s20 = scalar_select %p34_p7, %s444_s8, %s36_s15  }
  0x10   : > { %p532_p11 = por %p81_p10, %p49_p3  ;;  %s101_s22 = sand.u32 1, %s444_s8  }
  0x11   : > { %s267_s23 = sshll.u32 %s101_s22, 1  ;;  %s280_s24 = sshll.u32 %s452_s10, 5 }
  0x12   : > { %s111_s27 = scalar_lea.hbm %s621_s0, %s280_s24  ;;  %s105_s28 = scalar_lea.vmem [#allocation2], %s267_s23 }
  0x13   : > { %s112_s29 = sshll.u32 %s105_s28, 4  ;;  %p545_p0 = pnand %p294_p13, %p515_p4  ;;  %s113_s29 = int_to_ptr.vmem [resolvable:$true] %s112_s29 }
  0x14   : > { %p270_p1 = scmp.ge.s32.totalorder %s456_s11, 1  ;;  %s102_s2 = scalar_lea.sflag [#allocation3], %s101_s22 }
  0x15   : > { %p350_p2 = pneg %p545_p0  ;;  %s361_s3 = scalar_lea.vmem %s113_s29, 32 }
  0x16   : > { %p362_p3 = scmp.ne.s32.totalorder %s113_s29, %s361_s3  ;;  %s458_s4 = smov [#allocation2]  }
  0x17   : > { %s366_s5 = sshll.u32 %s458_s4, 4  ;;  %s367_s5 = int_to_ptr.vmem [resolvable:$false] %s366_s5 }
  0x18   : > { %p364_p5 = pnand %p362_p3, %p350_p2  ;;  %s368_s12 = scalar_lea.vmem %s367_s5, 64 }
  0x19   : > { %p369_p7 = scmp.lt.s32.totalorder %s113_s29, %s367_s5  ;;  %p370_p10 = scmp.lt.s32.totalorder %s368_s12, %s361_s3 }
  0x1a   : > { %p365_p6 = pneg %p364_p5 }
  0x1b   : > { %p371_p12 = por %p370_p10, %p369_p7 }
  0x1d   : > { %p372_p4 = pnand %p371_p12, %p365_p6 }
  0x1f   : > { %375 = shalt.err (!%p372_p4)
}
  0x20   : > { %s459_s13 = smov 16   ;;  %s460_s15 = smov 1  }
  0x21   : > { %289 = dma.hbm_to_vmem [thread:$0]  (!%p545_p0), %s111_s27, 32, %s113_s29, %s102_s2, %s459_s13, %s459_s13, %s460_s15  }
  0x22   : > { %p120_p13 = scmp.lt.s32.totalorder %s456_s11, 3 }
  0x24   : > { %p121_p2 = pnand %p270_p1, %p120_p13 }
  0x25   : > { %s558_s16 = sand.u32 (!%p121_p2), 1, %s440_s7  }
  0x26   : > { %124 = sbr.rel (%p121_p2) target bundleno = 69 (0x45), region = 24  ;;  %s271_s17 = sshll.u32 (!%p121_p2), %s558_s16, 1 }
  0x27   : > { %s127_s22 = scalar_lea.sflag (!%p121_p2), [#allocation3], %s558_s16  ;;  %s130_s23 = scalar_lea.vmem (!%p121_p2), [#allocation2], %s271_s17 }
  0x2b   : > { %427 = dma.done.wait (%p521_p8), %s127_s22, 32  }
  0x2c   : > { %429 = vsyncadd (%p521_p8), %s127_s22, 4294967264  ;;  %s272_s24 = sshll.u32 %s558_s16, 4  ;;  %s281_s27 = sshll.u32 %s448_s9, 8  ;;  %v273_v0 = vld [vmem:[%s130_s23] ss:$0 sm:$0xff] }
  0x2d   : > { %s148_s25 = scalar_lea.vmem [#allocation5], %s272_s24  ;;  %s573_s30 = scalar_lea.hbm %s622_s1, %s281_s27  ;;  %v274_v1 = vld [vmem:[%s130_s23 + $0x1] ss:$0 sm:$0xff] }
  0x2e   : > { %s180_s26 = sshll.u32 %s148_s25, 4  ;;  %163 = vst [vmem:[%s148_s25] sm:$0xff] %v273_v0  ;;  %164 = vst [vmem:[%s148_s25 + $0x8] sm:$0xff] %v274_v1  ;;  %s166_s18 = scalar_lea.sflag [#allocation4], %s558_s16  ;;  %s568_s26 = int_to_ptr.vmem [resolvable:$true] %s180_s26 }
  0x2f   : > { %s376_s2 = scalar_lea.vmem %s568_s26, 256  ;;  %s461_s9 = smov [#allocation5]  }
  0x30   : > { %p377_p8 = scmp.ne.s32.totalorder %s568_s26, %s376_s2  ;;  %s380_s3 = sshll.u32 %s461_s9, 4  ;;  %s381_s3 = int_to_ptr.vmem [resolvable:$false] %s380_s3 }
  0x31   : > { %s382_s4 = scalar_lea.vmem %s381_s3, 512  ;;  %p383_p1 = scmp.lt.s32.totalorder %s568_s26, %s381_s3 }
  0x32   : > { %p378_p12 = pnand %p377_p8, %p525_p9  ;;  %p384_p3 = scmp.lt.s32.totalorder %s382_s4, %s376_s2 }
  0x34   : > { %p379_p0 = pneg %p378_p12  ;;  %p385_p5 = por %p384_p3, %p383_p1 }
  0x36   : > { %p386_p6 = pnand %p385_p5, %p379_p0 }
  0x38   : > { %389 = shalt.err (!%p386_p6)
}
  0x39   : > { %s390_s5 = scalar_lea.hbm %s573_s30, 256  ;;  %s394_s15 = scalar_lea.hbm %s622_s1, 512 }
  0x3a   : > { %p391_p7 = scmp.ne.s32.totalorder %s573_s30, %s390_s5  ;;  %p395_p13 = scmp.lt.s32.totalorder %s573_s30, %s622_s1 }
  0x3b   : > { %p396_p2 = scmp.lt.s32.totalorder %s394_s15, %s390_s5 }
  0x3c   : > { %p392_p10 = pnand %p391_p7, %p525_p9 }
  0x3d   : > { %p397_p8 = por %p396_p2, %p395_p13 }
  0x3e   : > { %p393_p4 = pneg %p392_p10 }
  0x40   : > { %p398_p12 = pnand %p397_p8, %p393_p4 }
  0x42   : > { %401 = shalt.err (!%p398_p12)
}
  0x43   : > { %s462_s23 = smov 128   ;;  %s463_s24 = smov 8  }
  0x44   : > { %284 = dma.vmem_to_hbm [thread:$0]  (%p525_p9), %s568_s26, 256, %s573_s30, %s166_s18, %s462_s23, %s462_s23, %s463_s24  }
  0x45 PF: > { %s195_s25 = sand.u32 1, %s436_s6   ;;  %p628_p0 = scmp.ge.s32.totalorder %s456_s11, 2 }
  0x46   : > { %s196_s27 = scalar_lea.sflag [#allocation4], %s195_s25 }
  0x47   : > { %p291_p1 = pnand %p628_p0, %p532_p11 }
  0x49   : > { %p292_p3 = pneg %p291_p1 }
  0x4b   : > { %431 = dma.done.wait (%p292_p3), %s196_s27, 256  }
  0x4c   : > { %433 = vsyncadd (%p292_p3), %s196_s27, 4294967040  ;;  %s17_s11 = sadd.s32 1, %s456_s11   ;;  %s629_s6 = smov %s440_s7 }
  0x4d   : > { %p14_p5 = scmp.ge.s32.totalorder %s17_s11, 4   ;;  %s630_s7 = smov %s444_s8 }
  0x4e   : > { %s631_s8 = smov %s530_s20  ;;  %s632_s9 = smov %s452_s10 }
  0x4f   : > { %s633_s10 = smov %s635_s14  ;;  %16 = sbr.rel (!%p14_p5) target bundleno = 6 (0x6), region = 69 }
  0x54   :  { %201 = vsyncpa [#allocation3], 1 }
  0x55   :  { %203 = vsyncpa [#allocation3 + $0x1], 1 }
  0x56   :  { %204 = vsyncpa [#allocation4], 1 }
  0x57   :  { %206 = vsyncpa [#allocation4 + $0x1], 1 }

</bundles_post_ra>
